<compile_context>
chip_gen: v7x
topology: tpu7x:2x2x1
jax: 0.10.0
libtpu: 0.0.40
codegen_flags: <defaults>
</compile_context>

<pallas_src>
import math

import jax
import jax.numpy as jnp
from jax.experimental import pallas as pl
from jax.experimental.pallas import tpu as pltpu

F32 = jnp.float32
BF16 = jnp.bfloat16


def _round_up(v, m):
    return ((v + m - 1) // m) * m


# ----------------------------------------------------------------------------
# Single-buffering support probe (pipeline_mode=pl.Buffered(1))
# ----------------------------------------------------------------------------
_SINGLE_BUFFER_OK = None


def _single_buffer_supported():
    """Compile + run a trivial kernel once to check pl.Buffered(1) support."""
    global _SINGLE_BUFFER_OK
    if _SINGLE_BUFFER_OK is not None:
        return _SINGLE_BUFFER_OK
    try:
        def _probe(x_ref, o_ref):
            o_ref[...] = x_ref[...] + 1.0

        spec = pl.BlockSpec((8, 128), lambda i: (0, 0), pipeline_mode=pl.Buffered(1))
        out = pl.pallas_call(
            _probe,
            out_shape=jax.ShapeDtypeStruct((8, 128), F32),
            grid=(2,),
            in_specs=[spec],
            out_specs=pl.BlockSpec((8, 128), lambda i: (0, 0)),
        )(jnp.zeros((8, 128), F32))
        jax.block_until_ready(out)
        _SINGLE_BUFFER_OK = True
    except Exception:
        _SINGLE_BUFFER_OK = False
    return _SINGLE_BUFFER_OK


def _resident_spec(shape, index_map, *, single=True):
    """BlockSpec for operands whose block index is constant across the grid.
    Single-buffer them (halves their VMEM cost) when supported."""
    if single and _single_buffer_supported():
        return pl.BlockSpec(shape, index_map, pipeline_mode=pl.Buffered(1))
    return pl.BlockSpec(shape, index_map)


def _vmem_limit_bytes():
    """Scoped VMEM limit per pallas_call, sized from the hardware with headroom."""
    cap = 64 << 20  # conservative fallback (v7x per-TensorCore VMEM)
    try:
        cap = int(getattr(pltpu.get_tpu_info(), "vmem_capacity_bytes", cap))
    except Exception:
        pass
    return max(32 << 20, min(cap - (16 << 20), 100 << 20))


# ----------------------------------------------------------------------------
# In-kernel math helpers
# ----------------------------------------------------------------------------
def _log_softmax_rows(z):
    """Row-wise log_softmax in f32.  Closed form for the 2-class case
    (pure VPU/EUP, no cross-lane reduce on a 2-lane-occupied vreg)."""
    if z.shape[-1] == 2:
        z0 = z[:, 0:1]
        z1 = z[:, 1:2]
        m = jnp.maximum(z0, z1)
        lse = m + jnp.log(1.0 + jnp.exp(-jnp.abs(z1 - z0)))
        return z - lse
    m = jnp.max(z, axis=-1, keepdims=True)
    return (z - m) - jnp.log(jnp.sum(jnp.exp(z - m), axis=-1, keepdims=True))


# ----------------------------------------------------------------------------
# Pallas kernels
# ----------------------------------------------------------------------------
def _xw1_kernel(x_ref, w1_ref, xw_ref):
    """One row tile of XW1 = X @ W1 (bf16 operands, f32 accumulation)."""
    xw_ref[...] = jnp.dot(
        x_ref[...], w1_ref[...], preferred_element_type=jnp.float32
    ).astype(jnp.bfloat16)


def _gcn_fused_kernel(a_ref, x_ref, w1_ref, b1_ref, w2_ref, b2_ref, o_ref):
    """Whole forward pass, everything VMEM-resident (small-graph path)."""
    a = a_ref[...]
    xw = jnp.dot(x_ref[...], w1_ref[...],
                 preferred_element_type=jnp.float32).astype(jnp.bfloat16)
    h1 = jnp.maximum(jnp.dot(a, xw, preferred_element_type=jnp.float32)
                     + b1_ref[...], 0.0)
    ah = jnp.dot(a, h1.astype(jnp.bfloat16), preferred_element_type=jnp.float32)
    z = jnp.dot(ah.astype(jnp.bfloat16), w2_ref[...],
                preferred_element_type=jnp.float32) + b2_ref[...]
    o_ref[...] = _log_softmax_rows(z)


def _gcn_layer1_kernel(a_ref, xw_ref, b1_ref, h1_ref, acc_ref):
    """H1[i] = relu(sum_k A[i,k] @ XW1[k] + b1); f32 accumulation over the K grid
    axis, bf16 writeback.  (Padded A rows are zero -> padded H1 rows = relu(b1);
    harmless because the corresponding padded COLUMNS of A are zero in layer 2.)"""
    k = pl.program_id(1)

    @pl.when(k == 0)
    def _():
        acc_ref[...] = jnp.zeros_like(acc_ref)

    acc_ref[...] += jnp.dot(a_ref[...], xw_ref[...],
                            preferred_element_type=jnp.float32)

    @pl.when(k == pl.num_programs(1) - 1)
    def _():
        h1_ref[...] = jnp.maximum(acc_ref[...] + b1_ref[...], 0.0).astype(jnp.bfloat16)


def _gcn_layer2_kernel(a_ref, h1_ref, w2_ref, b2_ref, o_ref, acc_ref):
    """out[i] = log_softmax((sum_k A[i,k] @ H1[k]) @ W2 + b2)."""
    k = pl.program_id(1)

    @pl.when(k == 0)
    def _():
        acc_ref[...] = jnp.zeros_like(acc_ref)

    acc_ref[...] += jnp.dot(a_ref[...], h1_ref[...],
                            preferred_element_type=jnp.float32)

    @pl.when(k == pl.num_programs(1) - 1)
    def _():
        z = jnp.dot(acc_ref[...].astype(jnp.bfloat16), w2_ref[...],
                    preferred_element_type=jnp.float32) + b2_ref[...]
        o_ref[...] = _log_softmax_rows(z)


# ----------------------------------------------------------------------------
# Wrapper
# ----------------------------------------------------------------------------
def gcn_net_pallas(a_hat, x, w1, b1, w2, b2, *, row_tile=None, col_tile=None,
                   max_fused_n=512):
    """Forward pass: log_softmax(A_hat @ relu(A_hat @ (X W1) + b1) @ W2 + b2, axis=1)."""
    n, f_in = x.shape
    f_hid = w1.shape[1]
    f_out = w2.shape[1]
    f_in_pad = _round_up(f_in, 64)  # 35 -> 64, zero padded: numerically exact

    use_fused = (row_tile is None) and (col_tile is None) and (n <= max_fused_n)

    if use_fused:
        n_pad = _round_up(n, 8)
    else:
        vmem_limit = _vmem_limit_bytes()

        tm = row_tile if row_tile is not None else 512
        tm = max(8, min(_round_up(tm, 8), _round_up(n, 8)))

        # Worst-case per-call VMEM estimate (layer 1 dominates): double-buffered
        # bf16 A tile + XW1/H1 tile + bf16 out tile + f32 accumulator + slop.
        def _need(tm_, tk_):
            return (4 * tm_ * tk_            # A row tile, 2 buffers, bf16
                    + 4 * tk_ * f_hid        # XW1 / H1 tile, 2 buffers, bf16
                    + 4 * tm_ * f_hid        # out tile, 2 buffers, bf16
                    + 4 * tm_ * f_hid        # f32 accumulator scratch
                    + (1 << 20))             # small operands + compiler slop

        if col_tile is not None:
            tk = _round_up(col_tile, 128)
            if tk >= _round_up(n, 128):      # covers the whole contraction axis
                tk = None
        else:
            tk = None
            if _need(tm, _round_up(n, tm)) > vmem_limit:
                # K-tile the contraction axis: largest pow2 multiple of 128 that
                # fits the budget; shrink the row tile if even 128 does not.
                tk = 128
                while 2 * tk < n and _need(tm, 2 * tk) <= vmem_limit:
                    tk *= 2
                while _need(tm, tk) > vmem_limit and tm > 8:
                    tm = max(8, _round_up(tm // 2, 8))

        if tk is None:
            n_pad = _round_up(n, tm)
            tk = n_pad
            kt = 1
        else:
            n_pad = _round_up(n, math.lcm(tm, tk))
            kt = n_pad // tk

    # ---- pad & cast (A cast to bf16 BEFORE padding: no f32 (n_pad,n_pad) temp) ----
    a_p = jnp.pad(a_hat.astype(BF16), ((0, n_pad - n), (0, n_pad - n)))
    x_p = jnp.pad(x.astype(BF16), ((0, n_pad - n), (0, f_in_pad - f_in)))
    w1_p = jnp.pad(w1.astype(BF16), ((0, f_in_pad - f_in), (0, 0)))
    w2_p = w2.astype(BF16)
    b1_p = jnp.reshape(b1.astype(F32), (1, f_hid))
    b2_p = jnp.reshape(b2.astype(F32), (1, f_out))

    if use_fused:
        vmem = pl.BlockSpec(memory_space=pltpu.MemorySpace.VMEM)
        out = pl.pallas_call(
            _gcn_fused_kernel,
            out_shape=jax.ShapeDtypeStruct((n_pad, f_out), F32),
            in_specs=[vmem] * 6,
            out_specs=vmem,
        )(a_p, x_p, w1_p, b1_p, w2_p, b2_p)
        return out[:n]

    rows = n_pad // tm
    cp_rows = pltpu.CompilerParams(dimension_semantics=("parallel",),
                                   vmem_limit_bytes=vmem_limit)
    cp_rows_k = pltpu.CompilerParams(dimension_semantics=("parallel", "arbitrary"),
                                     vmem_limit_bytes=vmem_limit)

    # ---- precompute XW1 = X @ W1 once (tiny; avoids per-A-tile recompute) ----
    xw1 = pl.pallas_call(
        _xw1_kernel,
        out_shape=jax.ShapeDtypeStruct((n_pad, f_hid), BF16),
        grid_spec=pltpu.PrefetchScalarGridSpec(
            num_scalar_prefetch=0,
            grid=(rows,),
            in_specs=[
                pl.BlockSpec((tm, f_in_pad), lambda i: (i, 0)),
                _resident_spec((f_in_pad, f_hid), lambda i: (0, 0)),
            ],
            out_specs=pl.BlockSpec((tm, f_hid), lambda i: (i, 0)),
        ),
        compiler_params=cp_rows,
    )(x_p, w1_p)

    # ---- layer 1: H1 = relu(A_hat @ XW1 + b1), streamed over A (row, K) tiles ----
    h1 = pl.pallas_call(
        _gcn_layer1_kernel,
        out_shape=jax.ShapeDtypeStruct((n_pad, f_hid), BF16),
        grid_spec=pltpu.PrefetchScalarGridSpec(
            num_scalar_prefetch=0,
            grid=(rows, kt),
            in_specs=[
                pl.BlockSpec((tm, tk), lambda i, k: (i, k)),          # A tile (streamed)
                _resident_spec((tk, f_hid), lambda i, k: (k, 0),
                               single=(kt == 1)),                     # XW1
                _resident_spec((1, f_hid), lambda i, k: (0, 0)),      # b1
            ],
            out_specs=pl.BlockSpec((tm, f_hid), lambda i, k: (i, 0)),
            scratch_shapes=[pltpu.VMEM((tm, f_hid), F32)],
        ),
        compiler_params=cp_rows_k,
    )(a_p, xw1, b1_p)

    # ---- layer 2: out = log_softmax(A_hat @ H1 @ W2 + b2) ----
    out = pl.pallas_call(
        _gcn_layer2_kernel,
        out_shape=jax.ShapeDtypeStruct((n_pad, f_out), F32),
        grid_spec=pltpu.PrefetchScalarGridSpec(
            num_scalar_prefetch=0,
            grid=(rows, kt),
            in_specs=[
                pl.BlockSpec((tm, tk), lambda i, k: (i, k)),          # A tile (streamed)
                _resident_spec((tk, f_hid), lambda i, k: (k, 0),
                               single=(kt == 1)),                     # H1
                _resident_spec((f_hid, f_out), lambda i, k: (0, 0)),  # W2
                _resident_spec((1, f_out), lambda i, k: (0, 0)),      # b2
            ],
            out_specs=pl.BlockSpec((tm, f_out), lambda i, k: (i, 0)),
            scratch_shapes=[pltpu.VMEM((tm, f_hid), F32)],
        ),
        compiler_params=cp_rows_k,
    )(a_p, h1, w2_p, b2_p)
    return out[:n]


# ----------------------------------------------------------------------------
# Glue: dense GCN normalization, matching torch_geometric's gcn_norm with
# add_remaining_self_loops (existing self-loop weights are kept — duplicates
# SUM, matching the scatter — and nodes without one get a self-loop of weight 1).
# A_hat[target, source].
# ----------------------------------------------------------------------------
def build_normalized_adjacency(edge_index, edge_weight, num_nodes):
    row, col = edge_index[0], edge_index[1]          # source, target
    ew = edge_weight.astype(F32)
    is_loop = row == col

    a = jnp.zeros((num_nodes, num_nodes), F32)
    a = a.at[col, row].add(jnp.where(is_loop, 0.0, ew))

    loop_sum = jnp.zeros((num_nodes,), F32).at[row].add(jnp.where(is_loop, ew, 0.0))
    has_loop = jnp.zeros((num_nodes,), F32).at[row].add(is_loop.astype(F32)) > 0.0
    loop_w = jnp.where(has_loop, loop_sum, 1.0)
    a = a + jnp.diag(loop_w)

    deg = jnp.sum(a, axis=1)
    dinv = jnp.where(deg > 0.0, jax.lax.rsqrt(deg), 0.0)
    return dinv[:, None] * a * dinv[None, :]


def glorot(key, shape):
    fan_in, fan_out = shape
    limit = jnp.sqrt(6.0 / (fan_in + fan_out))
    return jax.random.uniform(key, shape, F32, -limit, limit)


# ----------------------------------------------------------------------------
# Pure-JAX references
# ----------------------------------------------------------------------------
def gcn_net_ref(a_hat, x, w1, b1, w2, b2):
    """Full-f32, PyTorch-ordered reference."""
    h1 = jnp.maximum(a_hat @ (x @ w1) + b1, 0.0)
    h2 = a_hat @ (h1 @ w2) + b2
    return jax.nn.log_softmax(h2, axis=1)


def gcn_net_ref_bf16(a_hat, x, w1, b1, w2, b2):
    """Reference with the kernel's exact bf16-operand / f32-accum math."""
    a = a_hat.astype(BF16)
    xw = jnp.dot(x.astype(BF16), w1.astype(BF16),
                 preferred_element_type=F32).astype(BF16)
    h1 = jnp.maximum(jnp.dot(a, xw, preferred_element_type=F32) + b1, 0.0)
    ah = jnp.dot(a, h1.astype(BF16), preferred_element_type=F32)
    z = jnp.dot(ah.astype(BF16), w2.astype(BF16), preferred_element_type=F32) + b2
    return jax.nn.log_softmax(z, axis=1)


if __name__ == "__main__":
    key = jax.random.PRNGKey(0)
    (k_x1, k_s1, k_d1, k_w1e, k_x2, k_s2, k_d2, k_w2e,
     k_w1, k_w2, k_b1, k_b2) = jax.random.split(key, 12)

    F_IN, F_HID, F_OUT = 35, 64, 2

    # Shared model parameters (nonzero biases so the bias path is tested)
    w1 = glorot(k_w1, (F_IN, F_HID))
    b1 = 0.1 * jax.random.normal(k_b1, (1, F_HID), F32)
    w2 = glorot(k_w2, (F_HID, F_OUT))
    b2 = 0.1 * jax.random.normal(k_b2, (1, F_OUT), F32)

    # ---- graph 1: small (fused single-launch path + tiny tiled path) ----
    N1, E1 = 64, 256
    x1 = jax.random.normal(k_x1, (N1, F_IN), F32)
    ei1 = jnp.stack([jax.random.randint(k_s1, (E1,), 0, N1, jnp.int32),
                     jax.random.randint(k_d1, (E1,), 0, N1, jnp.int32)], axis=0)
    ew1 = jax.random.uniform(k_w1e, (E1,), F32, 0.1, 1.0)
    a1 = build_normalized_adjacency(ei1, ew1, N1)

    out1_fused = gcn_net_pallas(a1, x1, w1, b1, w2, b2)                 # fused
    out1_tiled = gcn_net_pallas(a1, x1, w1, b1, w2, b2, row_tile=32)    # tiled, kt=1

    # ---- graph 2: exercises the row-tiled and K-tiled (reduction-grid) paths ----
    N2, E2 = 200, 1024
    x2 = jax.random.normal(k_x2, (N2, F_IN), F32)
    ei2 = jnp.stack([jax.random.randint(k_s2, (E2,), 0, N2, jnp.int32),
                     jax.random.randint(k_d2, (E2,), 0, N2, jnp.int32)], axis=0)
    ew2 = jax.random.uniform(k_w2e, (E2,), F32, 0.1, 1.0)
    a2 = build_normalized_adjacency(ei2, ew2, N2)

    out2_rows = gcn_net_pallas(a2, x2, w1, b1, w2, b2, row_tile=64)                 # kt=1
    out2_kt = gcn_net_pallas(a2, x2, w1, b1, w2, b2, row_tile=64, col_tile=128)     # kt=2

    jax.block_until_ready((out1_fused, out1_tiled, out2_rows, out2_kt))

    assert out1_fused.shape == (N1, F_OUT) and out1_tiled.shape == (N1, F_OUT)
    assert out2_rows.shape == (N2, F_OUT) and out2_kt.shape == (N2, F_OUT)

    # Tight checks vs a jnp reference using the identical bf16/f32-accum math.
    ref1 = gcn_net_ref_bf16(a1, x1, w1, b1, w2, b2)
    ref2 = gcn_net_ref_bf16(a2, x2, w1, b1, w2, b2)
    assert jnp.allclose(out1_fused, ref1, atol=2e-3, rtol=2e-3)
    assert jnp.allclose(out1_tiled, ref1, atol=2e-3, rtol=2e-3)
    assert jnp.allclose(out2_rows, ref2, atol=2e-3, rtol=2e-3)
    assert jnp.allclose(out2_kt, ref2, atol=2e-3, rtol=2e-3)

    # Loose sanity checks vs the full-f32, PyTorch-ordered reference
    # (bf16 matmul-operand rounding => wider tolerance).
    assert jnp.allclose(out1_fused, gcn_net_ref(a1, x1, w1, b1, w2, b2),
                        atol=2e-1, rtol=1e-1)
    assert jnp.allclose(out2_kt, gcn_net_ref(a2, x2, w1, b1, w2, b2),
                        atol=2e-1, rtol=1e-1)

    print("KERNEL_OK")
</pallas_src>

<mosaic_0001>
module attributes {stable_mosaic.version = 11 : i64} {
  func.func @_gcn_fused_kernel(%arg0: memref<64x64xbf16, #tpu.memory_space<vmem>>, %arg1: memref<64x64xbf16, #tpu.memory_space<vmem>>, %arg2: memref<64x64xbf16, #tpu.memory_space<vmem>>, %arg3: memref<1x64xf32, #tpu.memory_space<vmem>>, %arg4: memref<64x2xbf16, #tpu.memory_space<vmem>>, %arg5: memref<1x2xf32, #tpu.memory_space<vmem>>, %arg6: memref<64x2xf32, #tpu.memory_space<vmem>>) attributes {dimension_semantics = [], scalar_prefetch = 0 : i64, scratch_operands = 0 : i64, tpu.core_type = #tpu.core_type<tc>} {
    %c0 = arith.constant 0 : index
    %c0_0 = arith.constant 0 : index
    %0 = vector.load %arg0[%c0, %c0_0] : memref<64x64xbf16, #tpu.memory_space<vmem>>, vector<64x64xbf16>
    %c0_1 = arith.constant 0 : index
    %c0_2 = arith.constant 0 : index
    %1 = vector.load %arg1[%c0_1, %c0_2] : memref<64x64xbf16, #tpu.memory_space<vmem>>, vector<64x64xbf16>
    %c0_3 = arith.constant 0 : index
    %c0_4 = arith.constant 0 : index
    %2 = vector.load %arg2[%c0_3, %c0_4] : memref<64x64xbf16, #tpu.memory_space<vmem>>, vector<64x64xbf16>
    %cst = arith.constant dense<0.000000e+00> : vector<64x64xf32>
    %3 = tpu.matmul %1, %2, %cst {dimension_numbers = #tpu.dot_dimension_numbers<[1], [0], [0], [1], [0, 0, 1, 1], [], []>} : vector<64x64xbf16>, vector<64x64xbf16>, vector<64x64xf32> -> vector<64x64xf32>
    %4 = arith.truncf %3 : vector<64x64xf32> to vector<64x64xbf16>
    %cst_5 = arith.constant dense<0.000000e+00> : vector<64x64xf32>
    %5 = tpu.matmul %0, %4, %cst_5 {dimension_numbers = #tpu.dot_dimension_numbers<[1], [0], [0], [1], [0, 0, 1, 1], [], []>} : vector<64x64xbf16>, vector<64x64xbf16>, vector<64x64xf32> -> vector<64x64xf32>
    %c0_6 = arith.constant 0 : index
    %c0_7 = arith.constant 0 : index
    %6 = vector.load %arg3[%c0_6, %c0_7] : memref<1x64xf32, #tpu.memory_space<vmem>>, vector<1x64xf32>
    %7 = vector.broadcast %6 : vector<1x64xf32> to vector<64x64xf32>
    %8 = arith.addf %5, %7 : vector<64x64xf32>
    %cst_8 = arith.constant 0.000000e+00 : f32
    %9 = vector.broadcast %cst_8 : f32 to vector<64x64xf32>
    %10 = arith.maximumf %8, %9 : vector<64x64xf32>
    %11 = arith.truncf %10 : vector<64x64xf32> to vector<64x64xbf16>
    %cst_9 = arith.constant dense<0.000000e+00> : vector<64x64xf32>
    %12 = tpu.matmul %0, %11, %cst_9 {dimension_numbers = #tpu.dot_dimension_numbers<[1], [0], [0], [1], [0, 0, 1, 1], [], []>} : vector<64x64xbf16>, vector<64x64xbf16>, vector<64x64xf32> -> vector<64x64xf32>
    %13 = arith.truncf %12 : vector<64x64xf32> to vector<64x64xbf16>
    %c0_10 = arith.constant 0 : index
    %c0_11 = arith.constant 0 : index
    %14 = vector.load %arg4[%c0_10, %c0_11] : memref<64x2xbf16, #tpu.memory_space<vmem>>, vector<64x2xbf16>
    %cst_12 = arith.constant dense<0.000000e+00> : vector<64x2xf32>
    %15 = tpu.matmul %13, %14, %cst_12 {dimension_numbers = #tpu.dot_dimension_numbers<[1], [0], [0], [1], [0, 0, 1, 1], [], []>} : vector<64x64xbf16>, vector<64x2xbf16>, vector<64x2xf32> -> vector<64x2xf32>
    %c0_13 = arith.constant 0 : index
    %c0_14 = arith.constant 0 : index
    %16 = vector.load %arg5[%c0_13, %c0_14] : memref<1x2xf32, #tpu.memory_space<vmem>>, vector<1x2xf32>
    %17 = vector.broadcast %16 : vector<1x2xf32> to vector<64x2xf32>
    %18 = arith.addf %15, %17 : vector<64x2xf32>
    %19 = vector.extract_strided_slice %18 {offsets = [0, 0], sizes = [64, 1], strides = [1, 1]} : vector<64x2xf32> to vector<64x1xf32>
    %20 = vector.extract_strided_slice %18 {offsets = [0, 1], sizes = [64, 1], strides = [1, 1]} : vector<64x2xf32> to vector<64x1xf32>
    %21 = arith.maximumf %19, %20 : vector<64x1xf32>
    %22 = arith.subf %20, %19 : vector<64x1xf32>
    %23 = math.absf %22 : vector<64x1xf32>
    %cst_15 = arith.constant 0.000000e+00 : f32
    %24 = vector.broadcast %cst_15 : f32 to vector<64x1xf32>
    %25 = arith.subf %24, %23 : vector<64x1xf32>
    %26 = math.exp %25 : vector<64x1xf32>
    %cst_16 = arith.constant 1.000000e+00 : f32
    %27 = vector.broadcast %cst_16 : f32 to vector<64x1xf32>
    %28 = arith.addf %27, %26 : vector<64x1xf32>
    %29 = math.log %28 : vector<64x1xf32>
    %30 = arith.addf %21, %29 : vector<64x1xf32>
    %31 = vector.broadcast %30 : vector<64x1xf32> to vector<64x2xf32>
    %32 = arith.subf %18, %31 : vector<64x2xf32>
    %c0_17 = arith.constant 0 : index
    %c0_18 = arith.constant 0 : index
    %33 = vector.load %arg6[%c0_17, %c0_18] : memref<64x2xf32, #tpu.memory_space<vmem>>, vector<64x2xf32>
    tpu.vector_store %arg6[%c0_17, %c0_18], %32 {strides = array<i32>} : memref<64x2xf32, #tpu.memory_space<vmem>>, vector<64x2xf32>,
    return
  }
}

</mosaic_0001>

<bundles_post_ra>
// kernel: tpu_custom_call.1
= control target key start
LH: loop header
LB: loop body
LE: loop exit
PB: predicated region body
PF: predicated region fallthrough
CT: control target
= control target key end

     0   :  { %11 = vsyncpa [#allocation3], 0  ;;  %s1185_s0 = inlined_call_operand.vmem [shape: bf16[64,64], index: 0, kind: input, shape index: {}]   ;;  %s1186_s1 = inlined_call_operand.hbm [shape: bf16[64,64], index: 1, kind: input, shape index: {}]   ;;  %s1187_s2 = inlined_call_operand.hbm [shape: bf16[64,64], index: 2, kind: input, shape index: {}]   ;;  %s1188_s3 = inlined_call_operand.vmem [shape: f32[1,64], index: 3, kind: input, shape index: {}]   ;;  %s1189_s4 = inlined_call_operand.vmem [shape: bf16[64,2], index: 4, kind: input, shape index: {}]   ;;  %s1190_s5 = inlined_call_operand.vmem [shape: f32[1,2], index: 5, kind: input, shape index: {}]   ;;  %s1191_s6 = inlined_call_operand.vmem [shape: f32[64,2], index: 6, kind: output, shape index: {}]  }
   0x1   :  { %12 = vsyncpa [#allocation5], 0  ;;  %s969_s21 = smov [#allocation2]   ;;  %s921_s25 = scalar_lea.hbm %s1186_s1, 512 }
   0x2   :  { %s20_s22 = sshll.u32 %s969_s21, 4  ;;  %p922_p0 = scmp.ne.s32.totalorder %s1186_s1, %s921_s25  ;;  %s21_s22 = int_to_ptr.vmem [resolvable:$true] %s20_s22 }
   0x3   :  { %p925_p1 = scmp.lt.u32.totalorder %s921_s25, %s1186_s1 }
   0x5   :  { %p927_p2 = pnand %p925_p1, %p922_p0 }
   0x7   :  { %930 = shalt.err (!%p927_p2)
}
   0x8   :  { %s931_s30 = scalar_lea.vmem %s21_s22, 512  ;;  %p936_p4 = scmp.lt.s32.totalorder %s21_s22, %s21_s22 }
   0x9   :  { %p932_p3 = scmp.ne.s32.totalorder %s21_s22, %s931_s30  ;;  %p937_p5 = scmp.lt.s32.totalorder %s931_s30, %s931_s30 }
   0xb   :  { %p938_p6 = por %p937_p5, %p936_p4 }
   0xd   :  { %p939_p7 = pnand %p938_p6, %p932_p3 }
   0xf   :  { %942 = shalt.err (!%p939_p7)
}
  0x10   :  { %s970_s7 = smov 64   ;;  %s971_s8 = smov 4  }
  0x11   :  { %26 = dma.hbm_to_vmem [thread:$0]  %s1186_s1, 512, %s21_s22, [#allocation3], %s970_s7, %s970_s7, %s971_s8  }
  0x12   :  { %s972_s11 = smov [#allocation4]   ;;  %s943_s15 = scalar_lea.hbm %s1187_s2, 512 }
  0x13   :  { %s32_s12 = sshll.u32 %s972_s11, 4  ;;  %p944_p8 = scmp.ne.s32.totalorder %s1187_s2, %s943_s15  ;;  %s33_s12 = int_to_ptr.vmem [resolvable:$true] %s32_s12 }
  0x14   :  { %p947_p9 = scmp.lt.u32.totalorder %s943_s15, %s1187_s2 }
  0x16   :  { %p949_p10 = pnand %p947_p9, %p944_p8 }
  0x18   :  { %952 = shalt.err (!%p949_p10)
}
  0x19   :  { %s953_s20 = scalar_lea.vmem %s33_s12, 512  ;;  %p958_p12 = scmp.lt.s32.totalorder %s33_s12, %s33_s12 }
  0x1a   :  { %p954_p11 = scmp.ne.s32.totalorder %s33_s12, %s953_s20  ;;  %p959_p13 = scmp.lt.s32.totalorder %s953_s20, %s953_s20 }
  0x1c   :  { %p960_p0 = por %p959_p13, %p958_p12 }
  0x1e   :  { %p961_p1 = pnand %p960_p0, %p954_p11 }
  0x20   :  { %964 = shalt.err (!%p961_p1)
}
  0x21   :  { %38 = dma.hbm_to_vmem [thread:$0]  %s1187_s2, 512, %s33_s12, [#allocation5], %s970_s7, %s970_s7, %s971_s8  }
  0x22   :  { %965 = dma.done.wait [#allocation3], 512  }
  0x23   :  { %966 = vsyncadd [#allocation3], 4294966784 }
  0x24   :  { %967 = dma.done.wait [#allocation5], 512  }
  0x25   :  { %968 = vsyncadd [#allocation5], 4294966784  ;;  %v873_v0 = vld [vmem:[#allocation4] sm:$0xff]   ;;  %v874_v1 = vld [vmem:[#allocation4 + $0x8] sm:$0xff]   ;;  %vm120_vm0 = vcmask 523264   ;;  %s973_s14 = smov 1  }
  0x26   :  { %800 = vmatprep.subr.bf16.mxu0 %v873_v0  ;;  %v875_v2 = vld [vmem:[#allocation4 + $0x10] sm:$0xff]   ;;  %v877_v3 = vld [vmem:[#allocation2] sm:$0xff]   ;;  %v876_v4 = vld [vmem:[#allocation4 + $0x18] sm:$0xff]   ;;  %vm719_vm1 = vcmask 15360  }
  0x27   :  { %801 = vmatpush3.bf16.msra.mxu0 %v873_v0  ;;  %808 = vmatprep.mubr.msk.bf16.mxu0 %vm120_vm0, %v877_v3  ;;  %v878_v5 = vld [vmem:[#allocation2 + $0x8] sm:$0xff]   ;;  %v879_v6 = vld [vmem:[#allocation2 + $0x10] sm:$0xff]   ;;  %v880_v7 = vld [vmem:[#allocation2 + $0x18] sm:$0xff]  }
  0x28   :  { %802 = vmatprep.subr.bf16.mxu0 %v874_v1  ;;  %v881_v8 = vld [vmem:[%s1185_s0] sm:$0xff]   ;;  %v882_v21 = vld [vmem:[%s1185_s0 + $0x8] sm:$0xff]   ;;  %v883_v22 = vld [vmem:[%s1185_s0 + $0x10] sm:$0xff]  }
  0x29   :  { %824 = vmatprep.mubr.msk.bf16.mxu1 %vm120_vm0, %v881_v8  ;;  %v884_v23 = vld [vmem:[%s1185_s0 + $0x18] sm:$0xff]   ;;  %v885_v24 = vld [vmem:[%s1189_s4] sm:$0xff]   ;;  %v886_v25 = vld [vmem:[%s1189_s4 + $0x8] sm:$0xff]  }
  0x2a   :  { %v887_v26 = vld [vmem:[%s1189_s4 + $0x10] sm:$0xff]   ;;  %v746_v27 = vld [vmem:[%s1188_s3] ss:$0 sm:$0xff]  ;;  %v888_v56 = vld [vmem:[%s1189_s4 + $0x18] sm:$0xff]  }
  0x2b   :  { %803 = vmatpush3.bf16.msra.mxu0 %v874_v1 }
  0x2c   :  { %804 = vmatprep.subr.bf16.mxu0 %v875_v2 }
  0x2f   :  { %805 = vmatpush3.bf16.msra.mxu0 %v875_v2 }
  0x30   :  { %806 = vmatprep.subr.bf16.mxu0 %v876_v4 }
  0x33   :  { %807 = vmatpush3.bf16.msra.mxu0 %v876_v4 }
  0x36   :  { %809 = vmatmul.mubr.msk.bf16.vlgmr.msra.gmra.mrb[0].mxu0 %vm120_vm0, %v878_v5  ;;  %v759_v5 = vld [vmem:[%s1190_s5] ss:$0 sm:$0xff]  ;;  %s974_s5 = smov 127  }
  0x37   :  { %812 = vmatprep.mubr.msk.bf16.mxu0 %vm120_vm0, %v879_v6 }
  0x3e   :  { %813 = vmatmul.mubr.msk.bf16.gmra.mrb[4].mxu0 %vm120_vm0, %v880_v7 }
  0x3f   :  { %840 = vmatprep.mubr.msk.bf16.mxu0 %vm120_vm0, %v881_v8 }
 0x109   :  { %v810_v9 = vpop.f32.mrb[0].mxu0 }
 0x10a   :  { %v167_v10 = vpop.f32.mrb[1].mxu0 }
 0x10b   :  { %v811_v11 = vpop.f32.mrb[2].mxu0 }
 0x10c   :  { %v199_v12 = vpack.c.bf16 %v811_v11, %v810_v9  ;;  %v170_v13 = vpop.f32.mrb[3].mxu0 }
 0x10d   :  { %v198_v14 = vpack.c.bf16 %v170_v13, %v167_v10 }
 0x10f   :  { %816 = vmatprep.subr.bf16.mxu1 %v198_v14 }
 0x110   :  { %817 = vmatpush3.bf16.msra.mxu1 %v198_v14 }
 0x111   :  { %v814_v15 = vpop.f32.mrb[4].mxu0  ;;  %818 = vmatprep.subr.bf16.mxu1 %v199_v12 }
 0x112   :  { %v183_v16 = vpop.f32.mrb[5].mxu0 }
 0x113   :  { %v815_v17 = vpop.f32.mrb[6].mxu0 }
 0x114   :  { %v201_v18 = vpack.c.bf16 %v815_v17, %v814_v15  ;;  %v186_v19 = vpop.f32.mrb[7].mxu0  ;;  %819 = vmatpush3.bf16.msra.mxu1 %v199_v12 }
 0x115   :  { %v200_v20 = vpack.c.bf16 %v186_v19, %v183_v16 }
 0x117   :  { %820 = vmatprep.subr.bf16.mxu1 %v200_v20 }
 0x118   :  { %821 = vmatpush3.bf16.msra.mxu1 %v200_v20 }
 0x119   :  { %822 = vmatprep.subr.bf16.mxu1 %v201_v18 }
 0x11c   :  { %823 = vmatpush3.bf16.msra.mxu1 %v201_v18 }
 0x11d   :  { %848 = vmatprep.subr.bf16.mxu1 %v885_v24 }
 0x11f   :  { %825 = vmatmul.mubr.msk.bf16.vlgmr.msra.gmra.mrb[0].mxu1 %vm120_vm0, %v882_v21 }
 0x120   :  { %828 = vmatprep.mubr.msk.bf16.mxu1 %vm120_vm0, %v883_v22  ;;  %849 = vmatpush3.bf16.msra.mxu1 %v885_v24 }
 0x121   :  { %850 = vmatprep.subr.bf16.mxu1 %v886_v25 }
 0x124   :  { %851 = vmatpush3.bf16.msra.mxu1 %v886_v25 }
 0x125   :  { %852 = vmatprep.subr.bf16.mxu1 %v887_v26 }
 0x127   :  { %829 = vmatmul.mubr.msk.bf16.gmra.mrb[4].mxu1 %vm120_vm0, %v884_v23 }
 0x128   :  { %853 = vmatpush3.bf16.msra.mxu1 %v887_v26 }
 0x129   :  { %854 = vmatprep.subr.bf16.mxu1 %v888_v56 }
 0x12c   :  { %855 = vmatpush3.bf16.msra.mxu1 %v888_v56 }
 0x1f2   :  { %v826_v28 = vpop.f32.mrb[0].mxu1 }
 0x1f3   :  { %v284_v29 = vadd.f32 %v826_v28, %v746_v27  ;;  %v275_v30 = vpop.f32.mrb[1].mxu1 }
 0x1f4   :  { %v276_v31 = vadd.f32 %v746_v27, %v275_v30  ;;  %v827_v32 = vpop.f32.mrb[2].mxu1 }
 0x1f5   :  { %v287_v33 = vadd.f32 %v827_v32, %v746_v27  ;;  %v278_v34 = vpop.f32.mrb[3].mxu1  ;;  %v308_v36 = vmax.f32 %v284_v29, 0.0 }
 0x1f6   :  { %v279_v35 = vadd.f32 %v746_v27, %v278_v34  ;;  %v306_v38 = vmax.f32 %v276_v31, 0.0 }
 0x1f7   :  { %v309_v37 = vmax.f32 %v287_v33, 0.0 }
 0x1f8   :  { %v307_v39 = vmax.f32 %v279_v35, 0.0 }
 0x1f9   :  { %v315_v40 = vpack.c.bf16 %v309_v37, %v308_v36 }
 0x1fa   :  { %v314_v41 = vpack.c.bf16 %v307_v39, %v306_v38  ;;  %v830_v42 = vpop.f32.mrb[4].mxu1 }
 0x1fb   :  { %v300_v43 = vadd.f32 %v830_v42, %v746_v27  ;;  %v291_v44 = vpop.f32.mrb[5].mxu1 }
 0x1fc   :  { %v292_v45 = vadd.f32 %v746_v27, %v291_v44  ;;  %v831_v46 = vpop.f32.mrb[6].mxu1  ;;  %832 = vmatprep.subr.bf16.mxu0 %v314_v41 }
 0x1fd   :  { %v303_v47 = vadd.f32 %v831_v46, %v746_v27  ;;  %v294_v48 = vpop.f32.mrb[7].mxu1  ;;  %833 = vmatpush3.bf16.msra.mxu0 %v314_v41  ;;  %v312_v50 = vmax.f32 %v300_v43, 0.0 }
 0x1fe   :  { %v295_v49 = vadd.f32 %v746_v27, %v294_v48  ;;  %834 = vmatprep.subr.bf16.mxu0 %v315_v40  ;;  %v310_v52 = vmax.f32 %v292_v45, 0.0 }
 0x1ff   :  { %v313_v51 = vmax.f32 %v303_v47, 0.0 }
 0x200   :  { %v311_v53 = vmax.f32 %v295_v49, 0.0 }
 0x201   :  { %v317_v54 = vpack.c.bf16 %v313_v51, %v312_v50  ;;  %835 = vmatpush3.bf16.msra.mxu0 %v315_v40 }
 0x202   :  { %v316_v55 = vpack.c.bf16 %v311_v53, %v310_v52 }
 0x204   :  { %836 = vmatprep.subr.bf16.mxu0 %v316_v55 }
 0x205   :  { %837 = vmatpush3.bf16.msra.mxu0 %v316_v55 }
 0x206   :  { %838 = vmatprep.subr.bf16.mxu0 %v317_v54 }
 0x209   :  { %839 = vmatpush3.bf16.msra.mxu0 %v317_v54 }
 0x20c   :  { %841 = vmatmul.mubr.msk.bf16.vlgmr.msra.gmra.mrb[8].mxu0 %vm120_vm0, %v882_v21 }
 0x20d   :  { %844 = vmatprep.mubr.msk.bf16.mxu0 %vm120_vm0, %v883_v22 }
 0x214   :  { %845 = vmatmul.mubr.msk.bf16.gmra.mrb[12].mxu0 %vm120_vm0, %v884_v23 }
 0x2df   :  { %v842_v57 = vpop.f32.mrb[8].mxu0 }
 0x2e0   :  { %v352_v58 = vpop.f32.mrb[9].mxu0 }
 0x2e1   :  { %v843_v59 = vpop.f32.mrb[10].mxu0 }
 0x2e2   :  { %v384_v60 = vpack.c.bf16 %v843_v59, %v842_v57  ;;  %v355_v61 = vpop.f32.mrb[11].mxu0 }
 0x2e3   :  { %v383_v62 = vpack.c.bf16 %v355_v61, %v352_v58 }
 0x2e5   :  { %856 = vmatprep.mubr.msk.bf16.mxu1 %vm120_vm0, %v383_v62 }
 0x2e6   :  { %857 = vmatmul.mubr.msk.bf16.vlgmr.msra.gmra.mrb[8].mxu1 %vm120_vm0, %v384_v60 }
 0x2e7   :  { %v846_v63 = vpop.f32.mrb[12].mxu0 }
 0x2e8   :  { %v368_v0 = vpop.f32.mrb[13].mxu0 }
 0x2e9   :  { %v847_v1 = vpop.f32.mrb[14].mxu0 }
 0x2ea   :  { %v386_v2 = vpack.c.bf16 %v847_v1, %v846_v63  ;;  %v371_v3 = vpop.f32.mrb[15].mxu0 }
 0x2eb   :  { %v385_v4 = vpack.c.bf16 %v371_v3, %v368_v0  ;;  %v975_v3 = vmov 0  }
 0x2ec   :  { %871 = vset.pattern.permute.xlu1 %v975_v3  ;;  %872 = vset.pattern.permute.xlu0 %v975_v3 }
 0x2ed   :  { %860 = vmatprep.mubr.msk.bf16.mxu1 %vm120_vm0, %v385_v4 }
 0x2ee   :  { %861 = vmatmul.mubr.msk.bf16.gmra.mrb[12].mxu1 %vm120_vm0, %v386_v2 }
 0x3b9   :  { %v858_v6 = vpop.f32.mrb[8].mxu1 }
 0x3ba   :  { %v1081_v7 = vadd.f32 %v858_v6, %v759_v5  ;;  %v472_v8 = vpop.f32.mrb[9].mxu1 }
 0x3bb   :  { %v1083_v9 = vadd.f32 %v759_v5, %v472_v8  ;;  %v859_v10 = vpop.f32.mrb[10].mxu1 }
 0x3bc   :  { %547 = vrot.lane.b32.xlu1 %v1081_v7, %s973_s14  ;;  %v475_v11 = vpop.f32.mrb[11].mxu1  ;;  %v1087_v12 = vadd.f32 %v859_v10, %v759_v5 }
 0x3bd   :  { %543 = vrot.lane.b32.xlu0 %v1083_v9, %s973_s14  ;;  %v1089_v13 = vadd.f32 %v759_v5, %v475_v11 }
 0x3c0   :  { %549 = vrot.lane.b32.xlu1 %v1087_v12, %s973_s14 }
 0x3c1   :  { %545 = vrot.lane.b32.xlu0 %v1089_v13, %s973_s14  ;;  %v862_v14 = vpop.f32.mrb[12].mxu1 }
 0x3c2   :  { %v488_v15 = vpop.f32.mrb[13].mxu1  ;;  %v1098_v20 = vadd.f32 %v862_v14, %v759_v5 }
 0x3c3   :  { %v1093_v16 = vadd.f32 %v759_v5, %v488_v15  ;;  %v863_v17 = vpop.f32.mrb[14].mxu1 }
 0x3c4   :  { %v491_v18 = vpop.f32.mrb[15].mxu1  ;;  %v1101_v21 = vadd.f32 %v863_v17, %v759_v5 }
 0x3c5   :  { %v1095_v19 = vadd.f32 %v759_v5, %v491_v18  ;;  %551 = vrot.lane.b32.xlu0 %v1093_v16, %s973_s14 }
 0x3c7   :  { %553 = vrot.lane.b32.xlu1 %v1095_v19, %s973_s14 }
 0x3c9   :  { %555 = vrot.lane.b32.xlu0 %v1098_v20, %s973_s14 }
 0x3cb   :  { %557 = vrot.lane.b32.xlu1 %v1101_v21, %s973_s14 }
 0x3cd   :  { %511 = vrot.lane.b32.xlu0 %v1083_v9, %s974_s5 }
 0x3cf   :  { %513 = vrot.lane.b32.xlu1 %v1089_v13, %s974_s5 }
 0x3d1   :  { %515 = vrot.lane.b32.xlu0 %v1081_v7, %s974_s5 }
 0x3d3   :  { %517 = vrot.lane.b32.xlu1 %v1087_v12, %s974_s5 }
 0x3d5   :  { %519 = vrot.lane.b32.xlu0 %v1093_v16, %s974_s5 }
 0x3d7   :  { %525 = vrot.lane.b32.xlu1 %v1101_v21, %s974_s5 }
 0x3d9   :  { %523 = vrot.lane.b32.xlu0 %v1098_v20, %s974_s5 }
 0x3db   :  { %521 = vrot.lane.b32.xlu1 %v1095_v19, %s974_s5 }
 0x42e   :  { %v548_v22 = vpop.permute.xlu1 %547 }
 0x42f   :  { %v569_v23 = vsub.f32 %v1081_v7, %v548_v22  ;;  %v544_v24 = vpop.permute.xlu0 %543 }
 0x430   :  { %v567_v25 = vsub.f32 %v1083_v9, %v544_v24 }
 0x431   :  { %v577_v26 = vand.u32 2147483647, %v569_v23 }
 0x432   :  { %v575_v27 = vand.u32 2147483647, %v567_v25  ;;  %v550_v28 = vpop.permute.xlu1 %549 }
 0x433   :  { %v585_v29 = vsub.f32 0.0, %v577_v26  ;;  %v570_v30 = vsub.f32 %v1087_v12, %v550_v28  ;;  %v546_v31 = vpop.permute.xlu0 %545 }
 0x434   :  { %v583_v32 = vsub.f32 0.0, %v575_v27  ;;  %v568_v33 = vsub.f32 %v1089_v13, %v546_v31 }
 0x435   :  { %v595_v34 = vmul.f32 1.442695, %v585_v29  ;;  %v578_v35 = vand.u32 2147483647, %v570_v30 }
 0x436   :  { %v591_v36 = vmul.f32 1.442695, %v583_v32  ;;  %v576_v37 = vand.u32 2147483647, %v568_v33 }
 0x437   :  { %889 = vpow2.f32 %v595_v34  ;;  %v586_v38 = vsub.f32 0.0, %v578_v35  ;;  %v552_v39 = vpop.permute.xlu0 %551 }
 0x438   :  { %891 = vpow2.f32 %v591_v36  ;;  %v584_v40 = vsub.f32 0.0, %v576_v37  ;;  %v571_v41 = vsub.f32 %v1093_v16, %v552_v39 }
 0x439   :  { %v597_v42 = vmul.f32 1.442695, %v586_v38  ;;  %v554_v43 = vpop.permute.xlu1 %553 }
 0x43a   :  { %v593_v44 = vmul.f32 1.442695, %v584_v40  ;;  %v579_v45 = vand.u32 2147483647, %v571_v41  ;;  %v572_v46 = vsub.f32 %v1095_v19, %v554_v43 }
 0x43b   :  { %893 = vpow2.f32 %v597_v42  ;;  %v556_v47 = vpop.permute.xlu0 %555 }
 0x43c   :  { %895 = vpow2.f32 %v593_v44  ;;  %v587_v48 = vsub.f32 0.0, %v579_v45  ;;  %v580_v49 = vand.u32 2147483647, %v572_v46  ;;  %v573_v50 = vsub.f32 %v1098_v20, %v556_v47 }
 0x43d   :  { %v558_v51 = vpop.permute.xlu1 %557 }
 0x43e   :  { %v599_v52 = vmul.f32 1.442695, %v587_v48  ;;  %v588_v53 = vsub.f32 0.0, %v580_v49  ;;  %v581_v54 = vand.u32 2147483647, %v573_v50  ;;  %v574_v55 = vsub.f32 %v1101_v21, %v558_v51 }
 0x43f   :  { %v512_v39 = vpop.permute.xlu0 %511 }
 0x440   :  { %897 = vpow2.f32 %v599_v52  ;;  %v601_v56 = vmul.f32 1.442695, %v588_v53  ;;  %v589_v57 = vsub.f32 0.0, %v581_v54  ;;  %v582_v58 = vand.u32 2147483647, %v574_v55 }
 0x441   :  { %v890_v59 = vpop.eup %889  ;;  %v514_v40 = vpop.permute.xlu1 %513  ;;  %v535_v50 = vmax.f32 %v1083_v9, %v512_v39 }
 0x442   :  { %v892_v60 = vpop.eup %891  ;;  %v609_v61 = vadd.f32 1.0, %v890_v59  ;;  %899 = vpow2.f32 %v601_v56  ;;  %v603_v62 = vmul.f32 1.442695, %v589_v57  ;;  %v590_v63 = vsub.f32 0.0, %v582_v58 }
 0x443   :  { %v607_v0 = vadd.f32 1.0, %v892_v60  ;;  %v516_v41 = vpop.permute.xlu0 %515  ;;  %v536_v54 = vmax.f32 %v1089_v13, %v514_v40 }
 0x444   :  { %901 = vlog2.f32 %v609_v61  ;;  %v605_v1 = vmul.f32 1.442695, %v590_v63  ;;  %v537_v46 = vmax.f32 %v1081_v7, %v516_v41 }
 0x445   :  { %v894_v2 = vpop.eup %893  ;;  %903 = vlog2.f32 %v607_v0  ;;  %v518_v42 = vpop.permute.xlu1 %517 }
 0x446   :  { %v896_v4 = vpop.eup %895  ;;  %v610_v5 = vadd.f32 1.0, %v894_v2  ;;  %905 = vpow2.f32 %v603_v62  ;;  %v538_v55 = vmax.f32 %v1087_v12, %v518_v42 }
 0x447   :  { %v608_v6 = vadd.f32 1.0, %v896_v4  ;;  %907 = vpow2.f32 %v605_v1  ;;  %v520_v43 = vpop.permute.xlu0 %519 }
 0x448   :  { %909 = vlog2.f32 %v610_v5  ;;  %v539_v60 = vmax.f32 %v1093_v16, %v520_v43 }
 0x449   :  { %911 = vlog2.f32 %v608_v6  ;;  %v526_v44 = vpop.permute.xlu1 %525 }
 0x44a   :  { %v898_v8 = vpop.eup %897  ;;  %v542_v1 = vmax.f32 %v1101_v21, %v526_v44 }
 0x44b   :  { %v611_v10 = vadd.f32 1.0, %v898_v8  ;;  %v524_v45 = vpop.permute.xlu0 %523 }
 0x44c   :  { %v900_v11 = vpop.eup %899  ;;  %v541_v2 = vmax.f32 %v1098_v20, %v524_v45 }
 0x44d   :  { %913 = vlog2.f32 %v611_v10  ;;  %v612_v14 = vadd.f32 1.0, %v900_v11  ;;  %v522_v47 = vpop.permute.xlu1 %521 }
 0x44e   :  { %v902_v15 = vpop.eup %901  ;;  %v540_v61 = vmax.f32 %v1095_v19, %v522_v47 }
 0x44f   :  { %v904_v17 = vpop.eup %903  ;;  %915 = vlog2.f32 %v612_v14  ;;  %v620_v18 = vmul.f32 0.6931472, %v902_v15 }
 0x450   :  { %v906_v22 = vpop.eup %905  ;;  %v616_v28 = vmul.f32 0.6931472, %v904_v17 }
 0x451   :  { %v908_v23 = vpop.eup %907  ;;  %v613_v24 = vadd.f32 1.0, %v906_v22  ;;  %643 = vrot.lane.b32.xlu0 %v620_v18, %s974_s5 }
 0x452   :  { %v910_v25 = vpop.eup %909  ;;  %v614_v26 = vadd.f32 1.0, %v908_v23 }
 0x453   :  { %917 = vlog2.f32 %v613_v24  ;;  %v622_v27 = vmul.f32 0.6931472, %v910_v25  ;;  %v912_v29 = vpop.eup %911 }
 0x454   :  { %919 = vlog2.f32 %v614_v26  ;;  %v618_v31 = vmul.f32 0.6931472, %v912_v29 }
 0x455   :  { %645 = vrot.lane.b32.xlu1 %v622_v27, %s974_s5  ;;  %639 = vrot.lane.b32.xlu0 %v616_v28, %s974_s5 }
 0x457   :  { %v914_v30 = vpop.eup %913 }
 0x458   :  { %v624_v32 = vmul.f32 0.6931472, %v914_v30 }
 0x459   :  { %v916_v33 = vpop.eup %915  ;;  %641 = vrot.lane.b32.xlu1 %v618_v31, %s974_s5 }
 0x45a   :  { %647 = vrot.lane.b32.xlu0 %v624_v32, %s974_s5  ;;  %v626_v34 = vmul.f32 0.6931472, %v916_v33 }
 0x45d   :  { %v918_v35 = vpop.eup %917  ;;  %649 = vrot.lane.b32.xlu1 %v626_v34, %s974_s5 }
 0x45e   :  { %v920_v36 = vpop.eup %919  ;;  %v628_v37 = vmul.f32 0.6931472, %v918_v35 }
 0x45f   :  { %v630_v38 = vmul.f32 0.6931472, %v920_v36 }
 0x460   :  { %651 = vrot.lane.b32.xlu0 %v628_v37, %s974_s5 }
 0x461   :  { %653 = vrot.lane.b32.xlu1 %v630_v38, %s974_s5 }
 0x4c3   :  { %v644_v48 = vpop.permute.xlu0 %643 }
 0x4c4   :  { %v665_v49 = vadd.f32 %v644_v48, %v537_v46 }
 0x4c6   :  { %683 = vperm.xlu1 %871, %v665_v49  }
 0x4c7   :  { %v646_v51 = vpop.permute.xlu1 %645  ;;  %v640_v52 = vpop.permute.xlu0 %639 }
 0x4c8   :  { %v663_v53 = vadd.f32 %v640_v52, %v535_v50  ;;  %v666_v57 = vadd.f32 %v646_v51, %v538_v55 }
 0x4ca   :  { %673 = vperm.xlu0 %872, %v663_v53  }
 0x4cb   :  { %v642_v56 = vpop.permute.xlu1 %641 }
 0x4cc   :  { %v664_v58 = vadd.f32 %v642_v56, %v536_v54  ;;  %v648_v59 = vpop.permute.xlu0 %647 }
 0x4cd   :  { %v667_v63 = vadd.f32 %v648_v59, %v539_v60 }
 0x4ce   :  { %678 = vperm.xlu1 %871, %v664_v58   ;;  %688 = vperm.xlu0 %872, %v666_v57  }
 0x4cf   :  { %v650_v62 = vpop.permute.xlu1 %649 }
 0x4d0   :  { %v668_v0 = vadd.f32 %v650_v62, %v540_v61 }
 0x4d2   :  { %v652_v3 = vpop.permute.xlu0 %651  ;;  %698 = vperm.xlu0 %872, %v668_v0   ;;  %693 = vperm.xlu1 %871, %v667_v63  }
 0x4d3   :  { %v654_v4 = vpop.permute.xlu1 %653  ;;  %v669_v5 = vadd.f32 %v652_v3, %v541_v2 }
 0x4d4   :  { %v670_v6 = vadd.f32 %v654_v4, %v542_v1 }
 0x4d6   :  { %708 = vperm.xlu0 %872, %v670_v6   ;;  %703 = vperm.xlu1 %871, %v669_v5  }
 0x545   :  { %v684_v8 = vpop.permute.xlu1 %683 }
 0x546   :  { %v713_v10 = vsub.f32 %v1081_v7, %v684_v8 }
 0x548   :  { %722 = vst.msk [vmem:[%s1191_s6 + $0x10] sm:$0xff] %vm719_vm1, %v713_v10 }
 0x549   :  { %v674_v11 = vpop.permute.xlu0 %673 }
 0x54a   :  { %v711_v14 = vsub.f32 %v1083_v9, %v674_v11 }
 0x54c   :  { %720 = vst.msk [vmem:[%s1191_s6] sm:$0xff] %vm719_vm1, %v711_v14 }
 0x54d   :  { %v679_v15 = vpop.permute.xlu1 %678  ;;  %v689_v17 = vpop.permute.xlu0 %688 }
 0x54e   :  { %v712_v18 = vsub.f32 %v1089_v13, %v679_v15  ;;  %v714_v22 = vsub.f32 %v1087_v12, %v689_v17 }
 0x550   :  { %721 = vst.msk [vmem:[%s1191_s6 + $0x8] sm:$0xff] %vm719_vm1, %v712_v18  ;;  %723 = vst.msk [vmem:[%s1191_s6 + $0x18] sm:$0xff] %vm719_vm1, %v714_v22 }
 0x551   :  { %v694_v7 = vpop.permute.xlu1 %693  ;;  %v699_v9 = vpop.permute.xlu0 %698 }
 0x552   :  { %v715_v23 = vsub.f32 %v1093_v16, %v694_v7  ;;  %v716_v24 = vsub.f32 %v1095_v19, %v699_v9 }
 0x554   :  { %724 = vst.msk [vmem:[%s1191_s6 + $0x20] sm:$0xff] %vm719_vm1, %v715_v23  ;;  %725 = vst.msk [vmem:[%s1191_s6 + $0x28] sm:$0xff] %vm719_vm1, %v716_v24 }
 0x555   :  { %v704_v12 = vpop.permute.xlu1 %703  ;;  %v709_v13 = vpop.permute.xlu0 %708 }
 0x556   :  { %v717_v25 = vsub.f32 %v1098_v20, %v704_v12  ;;  %v718_v26 = vsub.f32 %v1101_v21, %v709_v13 }
 0x558   :  { %726 = vst.msk [vmem:[%s1191_s6 + $0x30] sm:$0xff] %vm719_vm1, %v717_v25  ;;  %727 = vst.msk [vmem:[%s1191_s6 + $0x38] sm:$0xff] %vm719_vm1, %v718_v26 }
 0x559   :  { %732 = vsyncpa [#allocation3], 1 }
 0x55a   :  { %733 = vsyncpa [#allocation5], 1 }

</bundles_post_ra>
